<compile_context>
chip_gen: v5e
topology: v5e:2x2
jax: 0.10.0
libtpu: 0.0.40
codegen_flags: <defaults>
</compile_context>

<pallas_src>
import functools

import jax
import jax.numpy as jnp
from jax.experimental import pallas as pl
from jax.experimental.pallas import tpu as pltpu


def _round_up(x, m):
    return ((x + m - 1) // m) * m


def _patch_embed_kernel(x_ref, w_ref, b_ref, o_ref):
    # x_ref: (tm, K)     bf16 patch rows (current M tile)
    # w_ref: (K, N_pad)  bf16 projection weight (VMEM-resident, fetched once)
    # b_ref: (1, N_pad)  f32 bias (VMEM-resident)
    # o_ref: (tm, N_pad) output tile (bf16 by default)
    acc = jnp.dot(x_ref[...], w_ref[...], preferred_element_type=jnp.float32)
    o_ref[...] = (acc + b_ref[...]).astype(o_ref.dtype)


def _choose_tm(M, tm_default):
    """M tile: multiple of 8, <= tm_default, and (when possible) >= 2 grid
    steps so both v7x TensorCores get work even for small problems."""
    m8 = _round_up(max(M, 1), 8)
    if m8 <= tm_default:
        if m8 >= 16:
            return _round_up((m8 + 1) // 2, 8)   # split into 2 parallel steps
        return m8
    return tm_default


def patch_embed_matmul(x_patches, weight, bias, *, tm=512,
                       compute_dtype=jnp.bfloat16, out_dtype=jnp.bfloat16):
    """x_patches: [M, K], weight: [K, N], bias: [N] -> [M, N] in out_dtype."""
    M, K = x_patches.shape
    K2, N = weight.shape
    assert K == K2, "weight K must match patch row length"

    N_pad = _round_up(N, 128)            # lane-dense output / weight tiles
    tm = _choose_tm(M, tm)
    grid_m = pl.cdiv(M, tm)              # masked edge block; no M-pad copy of x

    in_size = jnp.dtype(compute_dtype).itemsize
    out_size = jnp.dtype(out_dtype).itemsize

    # Double-buffered working set (weight/bias are only fetched once, but budget
    # their allocation conservatively) + slack for Mosaic internal scratch.
    working = (2 * tm * K * in_size            # x tiles
               + 2 * K * N_pad * in_size       # resident weight
               + 2 * N_pad * 4                 # resident bias
               + 2 * tm * N_pad * out_size)    # output tiles
    vmem_budget = working + (4 << 20)
    if vmem_budget > (56 << 20):               # headroom on v7x's 64 MiB VMEM
        raise ValueError(
            f"patch-embed VMEM working set {working / 2**20:.1f} MiB exceeds "
            "the budget; reduce tm or add a K/N-tiling fallback (TODO).")
    vmem_limit = max(vmem_budget, 16 << 20)

    x_c = x_patches.astype(compute_dtype)      # fuses with upstream transpose
    w_p = jnp.pad(weight.astype(compute_dtype), ((0, 0), (0, N_pad - N)))
    b_p = jnp.pad(bias.astype(jnp.float32), (0, N_pad - N)).reshape(1, N_pad)

    cost = pl.CostEstimate(
        flops=2 * M * K * N_pad,
        transcendentals=0,
        bytes_accessed=(M * K * in_size        # patch rows, read once
                        + K * N_pad * in_size  # weight, read once (resident)
                        + N_pad * 4            # bias
                        + M * N_pad * out_size))

    out = pl.pallas_call(
        _patch_embed_kernel,
        out_shape=jax.ShapeDtypeStruct((M, N_pad), out_dtype),
        grid_spec=pltpu.PrefetchScalarGridSpec(
            num_scalar_prefetch=0,
            grid=(grid_m,),
            in_specs=[
                pl.BlockSpec((tm, K), lambda i: (i, 0)),
                pl.BlockSpec((K, N_pad), lambda i: (0, 0)),   # resident weight
                pl.BlockSpec((1, N_pad), lambda i: (0, 0)),   # resident bias
            ],
            out_specs=pl.BlockSpec((tm, N_pad), lambda i: (i, 0)),
        ),
        compiler_params=pltpu.CompilerParams(
            dimension_semantics=("parallel",),
            vmem_limit_bytes=vmem_limit,
        ),
        cost_estimate=cost,
    )(x_c, w_p, b_p)

    return out[:, :N]


def patch_embed_forward(x_nchw, conv_weight, conv_bias, patch_size, *,
                        tm=512, out_dtype=jnp.bfloat16):
    """Equivalent of PatchEmbed.forward for the non-REARC (CVR) path.

    x_nchw:      [B, C, H, W]
    conv_weight: [embed_dim, C, P, P]   (PyTorch Conv2d layout)
    conv_bias:   [embed_dim]
    returns:     [B, num_patches, embed_dim] in out_dtype
    """
    B, C, H, W = x_nchw.shape
    P = patch_size
    E = conv_weight.shape[0]
    gh, gw = H // P, W // P
    num_patches = gh * gw

    # Non-overlapping PxP patches -> rows [B*num_patches, C*P*P].
    # reshape + transpose + the bf16 cast inside patch_embed_matmul fuse into a
    # single XLA pass over the image (no separate pad copy along M any more).
    xp = x_nchw.reshape(B, C, gh, P, gw, P)
    xp = jnp.transpose(xp, (0, 2, 4, 1, 3, 5))
    xp = xp.reshape(B * num_patches, C * P * P)

    # Conv2d(kernel=P, stride=P) as a matmul: weight [E, C, P, P] -> [C*P*P, E].
    w = conv_weight.reshape(E, C * P * P).T

    out = patch_embed_matmul(xp, w, conv_bias, tm=tm, out_dtype=out_dtype)
    return out.reshape(B, num_patches, E)  # == conv -> flatten(2) -> transpose(1, 2)


if __name__ == "__main__":
    # Small shapes consistent with the module.
    B, C, H = 2, 4, 16
    patch_size = 4
    embed_dim = 32

    key = jax.random.PRNGKey(0)
    kx, kw, kb = jax.random.split(key, 3)

    x = jax.random.normal(kx, (B, C, H, H), dtype=jnp.float32)
    fan_in = C * patch_size * patch_size
    conv_weight = jax.random.normal(
        kw, (embed_dim, C, patch_size, patch_size), dtype=jnp.float32) / jnp.sqrt(fan_in)
    conv_bias = jax.random.normal(kb, (embed_dim,), dtype=jnp.float32) * 0.01

    fwd = jax.jit(functools.partial(patch_embed_forward, patch_size=patch_size))
    out = fwd(x, conv_weight, conv_bias)
    jax.block_until_ready(out)

    num_patches = (H // patch_size) ** 2
    assert out.shape == (B, num_patches, embed_dim)
    assert out.dtype == jnp.bfloat16
    out_f32 = out.astype(jnp.float32)

    # Reference 1: bf16-rounded inputs, f32 accumulate, bf16 store (kernel path).
    xp = x.reshape(B, C, H // patch_size, patch_size, H // patch_size, patch_size)
    xp = jnp.transpose(xp, (0, 2, 4, 1, 3, 5)).reshape(B * num_patches, fan_in)
    w = conv_weight.reshape(embed_dim, fan_in).T
    ref_bf16 = (xp.astype(jnp.bfloat16).astype(jnp.float32)
                @ w.astype(jnp.bfloat16).astype(jnp.float32)
                + conv_bias).astype(jnp.bfloat16).astype(jnp.float32)
    ref_bf16 = ref_bf16.reshape(B, num_patches, embed_dim)
    assert jnp.allclose(out_f32, ref_bf16, atol=1e-2, rtol=1e-2)

    # Reference 2: full-f32 conv-as-matmul reference (looser tolerance for bf16).
    ref_f32 = (xp @ w + conv_bias).reshape(B, num_patches, embed_dim)
    assert jnp.allclose(out_f32, ref_f32, atol=3e-2, rtol=3e-2)

    print("KERNEL_OK")
</pallas_src>

<mosaic_0001>
module attributes {stable_mosaic.version = 11 : i64} {
  func.func @_patch_embed_kernel(%arg0: i32, %arg1: memref<16x64xbf16, #tpu.memory_space<vmem>>, %arg2: memref<64x128xbf16, #tpu.memory_space<vmem>>, %arg3: memref<1x128xf32, #tpu.memory_space<vmem>>, %arg4: memref<16x128xbf16, #tpu.memory_space<vmem>>) attributes {dimension_semantics = [#tpu.dimension_semantics<parallel>], iteration_bounds = array<i64: 2>, scalar_prefetch = 0 : i64, scratch_operands = 0 : i64, tpu.core_type = #tpu.core_type<tc>, window_params = [{transform_indices = @transform_0, window_bounds = array<i64: 16, 64>}, {pipeline_mode = #tpu.pipeline_mode<synchronous>, transform_indices = @transform_1, window_bounds = array<i64: 64, 128>}, {pipeline_mode = #tpu.pipeline_mode<synchronous>, transform_indices = @transform_2, window_bounds = array<i64: 1, 128>}, {transform_indices = @transform_3, window_bounds = array<i64: 16, 128>}]} {
    %c0 = arith.constant 0 : index
    %c0_0 = arith.constant 0 : index
    %0 = vector.load %arg1[%c0, %c0_0] : memref<16x64xbf16, #tpu.memory_space<vmem>>, vector<16x64xbf16>
    %c0_1 = arith.constant 0 : index
    %c0_2 = arith.constant 0 : index
    %1 = vector.load %arg2[%c0_1, %c0_2] : memref<64x128xbf16, #tpu.memory_space<vmem>>, vector<64x128xbf16>
    %cst = arith.constant dense<0.000000e+00> : vector<16x128xf32>
    %2 = tpu.matmul %0, %1, %cst {dimension_numbers = #tpu.dot_dimension_numbers<[1], [0], [0], [1], [0, 0, 1, 1], [], []>} : vector<16x64xbf16>, vector<64x128xbf16>, vector<16x128xf32> -> vector<16x128xf32>
    %c0_3 = arith.constant 0 : index
    %c0_4 = arith.constant 0 : index
    %3 = vector.load %arg3[%c0_3, %c0_4] : memref<1x128xf32, #tpu.memory_space<vmem>>, vector<1x128xf32>
    %4 = vector.broadcast %3 : vector<1x128xf32> to vector<16x128xf32>
    %5 = arith.addf %2, %4 : vector<16x128xf32>
    %6 = arith.truncf %5 : vector<16x128xf32> to vector<16x128xbf16>
    %c0_5 = arith.constant 0 : index
    %c0_6 = arith.constant 0 : index
    %7 = vector.load %arg4[%c0_5, %c0_6] : memref<16x128xbf16, #tpu.memory_space<vmem>>, vector<16x128xbf16>
    tpu.vector_store %arg4[%c0_5, %c0_6], %6 {strides = array<i32>} : memref<16x128xbf16, #tpu.memory_space<vmem>>, vector<16x128xbf16>,
    return
  }
  func.func @transform_0(%arg0: i32) -> (i32, i32) {
    %c0_i32 = arith.constant 0 : i32
    %c0_i32_0 = arith.constant 0 : i32
    return %arg0, %c0_i32 : i32, i32
  }
  func.func @transform_1(%arg0: i32) -> (i32, i32) {
    %c0_i32 = arith.constant 0 : i32
    %c0_i32_0 = arith.constant 0 : i32
    %c0_i32_1 = arith.constant 0 : i32
    return %c0_i32, %c0_i32_0 : i32, i32
  }
  func.func @transform_2(%arg0: i32) -> (i32, i32) {
    %c0_i32 = arith.constant 0 : i32
    %c0_i32_0 = arith.constant 0 : i32
    %c0_i32_1 = arith.constant 0 : i32
    return %c0_i32, %c0_i32_0 : i32, i32
  }
  func.func @transform_3(%arg0: i32) -> (i32, i32) {
    %c0_i32 = arith.constant 0 : i32
    %c0_i32_0 = arith.constant 0 : i32
    return %arg0, %c0_i32 : i32, i32
  }
}

</mosaic_0001>

<bundles_post_ra>
// kernel: patch_embed_forward.1
= control target key start
LH: loop header
LB: loop body
LE: loop exit
PB: predicated region body
PF: predicated region fallthrough
CT: control target
= control target key end

     0   :  { %8 = vsyncpa [#allocation3], 0  ;;  %s590_s0 = inlined_call_operand.vmem [shape: bf16[32,64], index: 0, kind: input, shape index: {}]   ;;  %s591_s1 = inlined_call_operand.vmem [shape: bf16[64,128], index: 1, kind: input, shape index: {}]   ;;  %s592_s2 = inlined_call_operand.vmem [shape: f32[1,128], index: 2, kind: input, shape index: {}]   ;;  %s593_s3 = inlined_call_operand.hbm [shape: bf16[32,128], index: 3, kind: output, shape index: {}]  }
   0x1   :  { %10 = vsyncpa [#allocation3 + $0x1], 0  ;;  %s488_s12 = smov 0   ;;  %s490_s13 = smov 0  }
   0x2   :  { %s492_s14 = smov 0   ;;  %s494_s15 = smov 0  }
   0x3 LB: > { %s509_s16 = sadd.s32 4294967295, %s464_s15   ;;  %s316_s17 = sadd.s32 4294967294, %s464_s15   ;;  %s464_s15 = sphi %s494_s15, %s599_s15   ;;  %s460_s14 = sphi %s492_s14, %s598_s14   ;;  %s456_s13 = sphi %s490_s13, %s597_s13   ;;  %s452_s12 = sphi %s488_s12, %s596_s12  }
   0x4   : > { %s513_s18 = sadd.s32 1, %s464_s15   ;;  %s91_s19 = sadd.s32 1, %s460_s14 }
   0x5   : > { %s88_s20 = ssub.s32 %s464_s15, %s513_s18  ;;  %p101_p0 = scmp.ne.s32.totalorder %s460_s14, %s456_s13 }
   0x6   : > { %p89_p1 = scmp.eq.s32.totalorder %s88_s20, 0  ;;  %p102_p2 = scmp.eq.s32.totalorder %s509_s16, 1 }
   0x7   : > { %p107_p3 = scmp.ne.s32.totalorder %s456_s13, %s452_s12  ;;  %p108_p4 = scmp.eq.s32.totalorder %s316_s17, 1 }
   0x8   : > { %s524_s21 = scalar_select %p89_p1, %s460_s14, %s91_s19  }
   0x9   : > { %p526_p5 = por %p102_p2, %p101_p0  ;;  %p530_p6 = por %p108_p4, %p107_p3 }
   0xa   : > { %p319_p7 = scmp.ge.s32.totalorder %s464_s15, 1  ;;  %p141_p8 = scmp.lt.s32.totalorder %s464_s15, 3 }
   0xc   : > { %p142_p9 = pnand %p319_p7, %p141_p8 }
   0xd   : > { %s321_s26 = sshll.u32 (!%p142_p9), %s509_s16, 1  ;;  %s162_s10 = sand.u32 (!%p142_p9), 1, %s456_s13  }
   0xe   : > { %145 = sbr.rel (%p142_p9) target bundleno = 177 (0xb1), region = 32  ;;  %p166_p10 = scmp.lt.s32.totalorder (!%p142_p9), %s321_s26, 3 }
   0xf   : > { %s320_s11 = sshll.u32 (!%p142_p9), %s162_s10, 3  ;;  %s354_s17 = sshll.u32 (!%p142_p9), %s509_s16, 3 }
  0x10   : > { %s250_s24 = scalar_lea.hbm (!%p142_p9), %s593_s3, %s354_s17  ;;  %s164_s27 = scalar_lea.vmem (!%p142_p9), [#allocation2], %s320_s11 }
  0x11   : > { %s560_s28 = sshll.u32 (!%p142_p9), %s164_s27, 4  ;;  %s253_s29 = sshll.u32 (!%p142_p9), %s250_s24, 4  ;;  %s252_s28 = int_to_ptr.vmem [resolvable:$true] %s560_s28  ;;  %s254_s29 = int_to_ptr.hbm [resolvable:$true] %s253_s29 }
  0x12   : > { %s239_s16 = scalar_lea.sflag (!%p142_p9), [#allocation3], %s162_s10  ;;  %s416_s30 = sshra.s32 (!%p142_p9), %s254_s29, 4  ;;  %s417_s30 = int_to_ptr.hbm [resolvable:$true] %s416_s30 }
  0x13   : > { %v353_v0 = vld [vmem:[%s591_s1 + $0x18] sm:$0xff]  ;;  %v352_v1 = vld [vmem:[%s591_s1 + $0x10] sm:$0xff]  ;;  %s601_s26 = smov (!%p166_p10, %s321_s26), 3  ;;  %v351_v2 = vld [vmem:[%s591_s1 + $0x8] sm:$0xff]  ;;  %vm216_vm0 = vcmask 523264   ;;  %s422_s7 = scalar_lea.hbm %s593_s3, 16 }
  0x14   : > { %224 = vmatpush.bf16.msra.mxu0 %v353_v0  ;;  %s322_s4 = sshll.u32 %s601_s26, 2  ;;  %v350_v3 = vld [vmem:[%s591_s1] sm:$0xff]  ;;  %p423_p0 = scmp.lt.s32.totalorder %s417_s30, %s593_s3 }
  0x15   : > { %s169_s9 = scalar_lea.vmem %s590_s0, %s322_s4  ;;  %v401_v6 = vld [vmem:[%s592_s2] ss:$0 sm:$0xff]  ;;  %s418_s4 = scalar_lea.hbm %s417_s30, 8 }
  0x16   : > { %v349_v4 = vld [vmem:[%s169_s9] sm:$0xff]  ;;  %p419_p11 = scmp.ne.s32.totalorder %s417_s30, %s418_s4  ;;  %p424_p1 = scmp.lt.s32.totalorder %s422_s7, %s418_s4 }
  0x18   : > { %225 = vmatpush.bf16.msra.mxu0 %v352_v1  ;;  %p420_p12 = pnand %p419_p11, %p526_p5  ;;  %p425_p2 = por %p424_p1, %p423_p0 }
  0x1a   : > { %p421_p13 = pneg %p420_p12 }
  0x1c   : > { %226 = vmatpush.bf16.msra.mxu0 %v351_v2  ;;  %p426_p3 = pnand %p425_p2, %p421_p13 }
  0x20   : > { %227 = vmatpush.bf16.msra.mxu0 %v350_v3 }
  0x23   : > { %343 = vmatmul.msk.bf16.vlgmr.msra.gmra.mxu0 %vm216_vm0, %v349_v4 }
  0xa0   : > { %v229_v5 = vpop.f32.mrf.mxu0 }
  0xa1   : > { %v230_v8 = vadd.f32 %v401_v6, %v229_v5 }
  0xa8   : > { %v231_v7 = vpop.f32.mrf.mxu0 }
  0xa9   : > { %v232_v9 = vadd.f32 %v401_v6, %v231_v7 }
  0xab   : > { %v358_v10 = vpack.c.bf16 %v232_v9, %v230_v8 }
  0xad   : > { %359 = vst [vmem:[%s164_s27] sm:$0xff] %v358_v10  }
  0xae   : > { %429 = shalt.err (!%p426_p3)
}
  0xaf   : > { %s466_s10 = smov 64   ;;  %s467_s11 = smov 4  }
  0xb0   : > { %360 = dma.vmem_to_hbm [thread:$0]  (%p526_p5), %s252_s28, 128, %s254_s29, %s239_s16, %s466_s10, %s466_s10, %s467_s11  }
  0xb1 PF: > { %p366_p4 = scmp.ge.s32.totalorder %s464_s15, 2  ;;  %s268_s17 = sand.u32 1, %s452_s12  }
  0xb2   : > { %s269_s19 = scalar_lea.sflag [#allocation3], %s268_s17 }
  0xb3   : > { %p363_p7 = pnand %p366_p4, %p530_p6 }
  0xb5   : > { %p364_p8 = pneg %p363_p7 }
  0xb7   : > { %447 = dma.done.wait (%p364_p8), %s269_s19, 128  }
  0xb8   : > { %449 = vsyncadd (%p364_p8), %s269_s19, 4294967168  ;;  %p13_p9 = scmp.ge.s32.totalorder %s513_s18, 4   ;;  %s596_s12 = smov %s456_s13 }
  0xb9   : > { %s597_s13 = smov %s460_s14  ;;  %s598_s14 = smov %s524_s21 }
  0xba   : > { %s599_s15 = smov %s513_s18  ;;  %15 = sbr.rel (!%p13_p9) target bundleno = 3 (0x3), region = 67 }
  0xbf   :  { %275 = vsyncpa [#allocation3], 1 }
  0xc0   :  { %277 = vsyncpa [#allocation3 + $0x1], 1 }

</bundles_post_ra>
